<compile_context>
chip_gen: v7x
topology: tpu7x:2x2x1
jax: 0.10.0
libtpu: 0.0.40
codegen_flags: <defaults>
</compile_context>

<pallas_src>
import jax
import jax.numpy as jnp
from jax.experimental import pallas as pl
from jax.experimental.pallas import tpu as pltpu

IN_FEATURES = 28 * 28     # 784
HIDDEN = 32
NUM_CLASSES = 10
PAD = 128                 # lane-dense padded width for hidden layers and output
TB_MAX = 1024             # batch tile: 2 bufs * 1024*784*2B ~ 3.1 MiB, fits v5e/v6e/v7x


def _round_up(n, m):
    return ((n + m - 1) // m) * m


def mlp_kernel(x_ref, w1_ref, b1_ref, w2_ref, b2_ref, w3_ref, b3_ref,
               w4_ref, b4_ref, o_ref):
    # x tile is bf16; all matmuls run on the MXU with f32 accumulation.
    x = x_ref[...]
    h = jnp.dot(x, w1_ref[...], preferred_element_type=jnp.float32) + b1_ref[...]
    h = jnp.maximum(h, 0.0)
    h = jnp.dot(h.astype(jnp.bfloat16), w2_ref[...],
                preferred_element_type=jnp.float32) + b2_ref[...]
    h = jnp.maximum(h, 0.0)
    h = jnp.dot(h.astype(jnp.bfloat16), w3_ref[...],
                preferred_element_type=jnp.float32) + b3_ref[...]
    h = jnp.maximum(h, 0.0)
    logits = jnp.dot(h.astype(jnp.bfloat16), w4_ref[...],
                     preferred_element_type=jnp.float32) + b4_ref[...]

    # Padded class columns (>= NUM_CLASSES) must not enter the log-sum-exp.
    col = jax.lax.broadcasted_iota(jnp.int32, logits.shape, 1)
    logits = jnp.where(col < NUM_CLASSES, logits, -jnp.inf)

    m = jnp.max(logits, axis=1, keepdims=True)
    shifted = logits - m
    lse = jnp.log(jnp.sum(jnp.exp(shifted), axis=1, keepdims=True))
    o_ref[...] = (shifted - lse).astype(o_ref.dtype)


def init_params(key):
    """Deterministic init matching PyTorch Linear shapes: W is (out, in), b is (out,)."""
    dims = [(HIDDEN, IN_FEATURES), (HIDDEN, HIDDEN), (HIDDEN, HIDDEN),
            (NUM_CLASSES, HIDDEN)]
    params = []
    for i, (out_f, in_f) in enumerate(dims):
        kw, kb = jax.random.split(jax.random.fold_in(key, i))
        bound = 1.0 / jnp.sqrt(in_f)
        w = jax.random.uniform(kw, (out_f, in_f), jnp.float32, -bound, bound)
        b = jax.random.uniform(kb, (out_f,), jnp.float32, -bound, bound)
        params.append((w, b))
    return params


def prepare_params(params):
    """One-time prep: transpose to (in, out), zero-pad to lane-dense widths, cast W to bf16."""
    prepped = []
    for idx, (w, b) in enumerate(params):
        out_f, in_f = w.shape
        in_pad = IN_FEATURES if idx == 0 else PAD
        wt = jnp.zeros((in_pad, PAD), jnp.float32).at[:in_f, :out_f].set(w.T)
        bp = jnp.zeros((1, PAD), jnp.float32).at[0, :out_f].set(b)
        prepped.append((wt.astype(jnp.bfloat16), bp))
    return prepped


def net_forward(x, prepped):
    (w1, b1), (w2, b2), (w3, b3), (w4, b4) = prepped
    B = x.shape[0]
    TB = min(TB_MAX, _round_up(B, 8))
    B_pad = _round_up(B, TB)
    if B_pad != B:
        x = jnp.pad(x, ((0, B_pad - B), (0, 0)))
    x = x.astype(jnp.bfloat16)
    grid = (B_pad // TB,)

    x_spec = pl.BlockSpec((TB, IN_FEATURES), lambda i: (i, 0))
    out_spec = pl.BlockSpec((TB, PAD), lambda i: (i, 0))

    def resident(arr):
        # Full-array block with constant index -> stays resident in VMEM across grid steps.
        return pl.BlockSpec(arr.shape, lambda i: (0, 0))

    weight_bytes = sum(int(w.size) * w.dtype.itemsize + int(b.size) * b.dtype.itemsize
                       for w, b in prepped)
    cost = pl.CostEstimate(
        flops=2 * B_pad * (IN_FEATURES * PAD + 3 * PAD * PAD),
        transcendentals=B_pad * PAD,
        bytes_accessed=B_pad * IN_FEATURES * 2 + weight_bytes + B_pad * PAD * 4,
    )

    out = pl.pallas_call(
        mlp_kernel,
        out_shape=jax.ShapeDtypeStruct((B_pad, PAD), jnp.float32),
        grid=grid,
        in_specs=[
            x_spec,
            resident(w1), resident(b1),
            resident(w2), resident(b2),
            resident(w3), resident(b3),
            resident(w4), resident(b4),
        ],
        out_specs=out_spec,
        compiler_params=pltpu.CompilerParams(
            dimension_semantics=("parallel",)),
        cost_estimate=cost,
    )(x, w1, b1, w2, b2, w3, b3, w4, b4)
    return out[:B, :NUM_CLASSES]


def reference_forward(x, params):
    """Pure-JAX f32 reference matching the PyTorch module."""
    h = x
    for i, (w, b) in enumerate(params):
        h = h @ w.T + b
        if i < 3:
            h = jnp.maximum(h, 0.0)
    return jax.nn.log_softmax(h, axis=1)


if __name__ == "__main__":
    key = jax.random.PRNGKey(0)
    params = init_params(key)
    prepped = prepare_params(params)
    x = jax.random.normal(jax.random.fold_in(key, 100), (8, IN_FEATURES), jnp.float32)

    out = net_forward(x, prepped)
    jax.block_until_ready(out)

    ref = reference_forward(x, params)
    assert out.shape == (8, NUM_CLASSES)
    # bf16 matmul inputs (f32 accumulation) -> allow bf16-level tolerance vs f32 reference.
    assert jnp.allclose(out, ref, atol=5e-2, rtol=5e-2), "mismatch vs reference"
    # Sanity: log-probs must normalize over the 10 real classes.
    assert jnp.allclose(jnp.sum(jnp.exp(out), axis=1), 1.0, atol=1e-3)
    print("KERNEL_OK")
</pallas_src>

<mosaic_0001>
module attributes {stable_mosaic.version = 11 : i64} {
  func.func @mlp_kernel(%arg0: i32, %arg1: memref<8x784xbf16, #tpu.memory_space<vmem>>, %arg2: memref<784x128xbf16, #tpu.memory_space<vmem>>, %arg3: memref<1x128xf32, #tpu.memory_space<vmem>>, %arg4: memref<128x128xbf16, #tpu.memory_space<vmem>>, %arg5: memref<1x128xf32, #tpu.memory_space<vmem>>, %arg6: memref<128x128xbf16, #tpu.memory_space<vmem>>, %arg7: memref<1x128xf32, #tpu.memory_space<vmem>>, %arg8: memref<128x128xbf16, #tpu.memory_space<vmem>>, %arg9: memref<1x128xf32, #tpu.memory_space<vmem>>, %arg10: memref<8x128xf32, #tpu.memory_space<vmem>>) attributes {dimension_semantics = [#tpu.dimension_semantics<parallel>], iteration_bounds = array<i64: 1>, scalar_prefetch = 0 : i64, scratch_operands = 0 : i64, tpu.core_type = #tpu.core_type<tc>, window_params = [{transform_indices = @transform_0, window_bounds = array<i64: 8, 784>}, {pipeline_mode = #tpu.pipeline_mode<synchronous>, transform_indices = @transform_1, window_bounds = array<i64: 784, 128>}, {pipeline_mode = #tpu.pipeline_mode<synchronous>, transform_indices = @transform_2, window_bounds = array<i64: 1, 128>}, {pipeline_mode = #tpu.pipeline_mode<synchronous>, transform_indices = @transform_3, window_bounds = array<i64: 128, 128>}, {pipeline_mode = #tpu.pipeline_mode<synchronous>, transform_indices = @transform_4, window_bounds = array<i64: 1, 128>}, {pipeline_mode = #tpu.pipeline_mode<synchronous>, transform_indices = @transform_5, window_bounds = array<i64: 128, 128>}, {pipeline_mode = #tpu.pipeline_mode<synchronous>, transform_indices = @transform_6, window_bounds = array<i64: 1, 128>}, {pipeline_mode = #tpu.pipeline_mode<synchronous>, transform_indices = @transform_7, window_bounds = array<i64: 128, 128>}, {pipeline_mode = #tpu.pipeline_mode<synchronous>, transform_indices = @transform_8, window_bounds = array<i64: 1, 128>}, {transform_indices = @transform_9, window_bounds = array<i64: 8, 128>}]} {
    %c0 = arith.constant 0 : index
    %c0_0 = arith.constant 0 : index
    %0 = vector.load %arg1[%c0, %c0_0] : memref<8x784xbf16, #tpu.memory_space<vmem>>, vector<8x784xbf16>
    %c0_1 = arith.constant 0 : index
    %c0_2 = arith.constant 0 : index
    %1 = vector.load %arg2[%c0_1, %c0_2] : memref<784x128xbf16, #tpu.memory_space<vmem>>, vector<784x128xbf16>
    %cst = arith.constant dense<0.000000e+00> : vector<8x128xf32>
    %2 = tpu.matmul %0, %1, %cst {dimension_numbers = #tpu.dot_dimension_numbers<[1], [0], [0], [1], [0, 0, 1, 1], [], []>} : vector<8x784xbf16>, vector<784x128xbf16>, vector<8x128xf32> -> vector<8x128xf32>
    %c0_3 = arith.constant 0 : index
    %c0_4 = arith.constant 0 : index
    %3 = vector.load %arg3[%c0_3, %c0_4] : memref<1x128xf32, #tpu.memory_space<vmem>>, vector<1x128xf32>
    %4 = vector.broadcast %3 : vector<1x128xf32> to vector<8x128xf32>
    %5 = arith.addf %2, %4 : vector<8x128xf32>
    %cst_5 = arith.constant 0.000000e+00 : f32
    %6 = vector.broadcast %cst_5 : f32 to vector<8x128xf32>
    %7 = arith.maximumf %5, %6 : vector<8x128xf32>
    %8 = arith.truncf %7 : vector<8x128xf32> to vector<8x128xbf16>
    %c0_6 = arith.constant 0 : index
    %c0_7 = arith.constant 0 : index
    %9 = vector.load %arg4[%c0_6, %c0_7] : memref<128x128xbf16, #tpu.memory_space<vmem>>, vector<128x128xbf16>
    %cst_8 = arith.constant dense<0.000000e+00> : vector<8x128xf32>
    %10 = tpu.matmul %8, %9, %cst_8 {dimension_numbers = #tpu.dot_dimension_numbers<[1], [0], [0], [1], [0, 0, 1, 1], [], []>} : vector<8x128xbf16>, vector<128x128xbf16>, vector<8x128xf32> -> vector<8x128xf32>
    %c0_9 = arith.constant 0 : index
    %c0_10 = arith.constant 0 : index
    %11 = vector.load %arg5[%c0_9, %c0_10] : memref<1x128xf32, #tpu.memory_space<vmem>>, vector<1x128xf32>
    %12 = vector.broadcast %11 : vector<1x128xf32> to vector<8x128xf32>
    %13 = arith.addf %10, %12 : vector<8x128xf32>
    %cst_11 = arith.constant 0.000000e+00 : f32
    %14 = vector.broadcast %cst_11 : f32 to vector<8x128xf32>
    %15 = arith.maximumf %13, %14 : vector<8x128xf32>
    %16 = arith.truncf %15 : vector<8x128xf32> to vector<8x128xbf16>
    %c0_12 = arith.constant 0 : index
    %c0_13 = arith.constant 0 : index
    %17 = vector.load %arg6[%c0_12, %c0_13] : memref<128x128xbf16, #tpu.memory_space<vmem>>, vector<128x128xbf16>
    %cst_14 = arith.constant dense<0.000000e+00> : vector<8x128xf32>
    %18 = tpu.matmul %16, %17, %cst_14 {dimension_numbers = #tpu.dot_dimension_numbers<[1], [0], [0], [1], [0, 0, 1, 1], [], []>} : vector<8x128xbf16>, vector<128x128xbf16>, vector<8x128xf32> -> vector<8x128xf32>
    %c0_15 = arith.constant 0 : index
    %c0_16 = arith.constant 0 : index
    %19 = vector.load %arg7[%c0_15, %c0_16] : memref<1x128xf32, #tpu.memory_space<vmem>>, vector<1x128xf32>
    %20 = vector.broadcast %19 : vector<1x128xf32> to vector<8x128xf32>
    %21 = arith.addf %18, %20 : vector<8x128xf32>
    %cst_17 = arith.constant 0.000000e+00 : f32
    %22 = vector.broadcast %cst_17 : f32 to vector<8x128xf32>
    %23 = arith.maximumf %21, %22 : vector<8x128xf32>
    %24 = arith.truncf %23 : vector<8x128xf32> to vector<8x128xbf16>
    %c0_18 = arith.constant 0 : index
    %c0_19 = arith.constant 0 : index
    %25 = vector.load %arg8[%c0_18, %c0_19] : memref<128x128xbf16, #tpu.memory_space<vmem>>, vector<128x128xbf16>
    %cst_20 = arith.constant dense<0.000000e+00> : vector<8x128xf32>
    %26 = tpu.matmul %24, %25, %cst_20 {dimension_numbers = #tpu.dot_dimension_numbers<[1], [0], [0], [1], [0, 0, 1, 1], [], []>} : vector<8x128xbf16>, vector<128x128xbf16>, vector<8x128xf32> -> vector<8x128xf32>
    %c0_21 = arith.constant 0 : index
    %c0_22 = arith.constant 0 : index
    %27 = vector.load %arg9[%c0_21, %c0_22] : memref<1x128xf32, #tpu.memory_space<vmem>>, vector<1x128xf32>
    %28 = vector.broadcast %27 : vector<1x128xf32> to vector<8x128xf32>
    %29 = arith.addf %26, %28 : vector<8x128xf32>
    %30 = tpu.iota {dimensions = array<i32: 1>} : vector<8x128xi32>
    %c10_i32 = arith.constant 10 : i32
    %31 = vector.broadcast %c10_i32 : i32 to vector<8x128xi32>
    %32 = arith.cmpi slt, %30, %31 : vector<8x128xi32>
    %cst_23 = arith.constant 0xFF800000 : f32
    %33 = vector.broadcast %cst_23 : f32 to vector<8x128xf32>
    %34 = arith.select %32, %29, %33 : vector<8x128xi1>, vector<8x128xf32>
    %cst_24 = arith.constant dense<0xFF800000> : vector<8xf32>
    %35 = vector.multi_reduction <maximumf>, %34, %cst_24 [1] : vector<8x128xf32> to vector<8xf32>
    %36 = vector.shape_cast %35 : vector<8xf32> to vector<8x1xf32>
    %37 = vector.broadcast %36 : vector<8x1xf32> to vector<8x128xf32>
    %38 = arith.subf %34, %37 : vector<8x128xf32>
    %39 = math.exp %38 : vector<8x128xf32>
    %cst_25 = arith.constant dense<0.000000e+00> : vector<8xf32>
    %40 = vector.multi_reduction <add>, %39, %cst_25 [1] : vector<8x128xf32> to vector<8xf32>
    %41 = vector.shape_cast %40 : vector<8xf32> to vector<8x1xf32>
    %42 = math.log %41 : vector<8x1xf32>
    %43 = vector.broadcast %42 : vector<8x1xf32> to vector<8x128xf32>
    %44 = arith.subf %38, %43 : vector<8x128xf32>
    %c0_26 = arith.constant 0 : index
    %c0_27 = arith.constant 0 : index
    %45 = vector.load %arg10[%c0_26, %c0_27] : memref<8x128xf32, #tpu.memory_space<vmem>>, vector<8x128xf32>
    tpu.vector_store %arg10[%c0_26, %c0_27], %44 {strides = array<i32>} : memref<8x128xf32, #tpu.memory_space<vmem>>, vector<8x128xf32>,
    return
  }
  func.func @transform_0(%arg0: i32) -> (i32, i32) {
    %c0_i32 = arith.constant 0 : i32
    %c0_i32_0 = arith.constant 0 : i32
    return %arg0, %c0_i32 : i32, i32
  }
  func.func @transform_1(%arg0: i32) -> (i32, i32) {
    %c0_i32 = arith.constant 0 : i32
    %c0_i32_0 = arith.constant 0 : i32
    %c0_i32_1 = arith.constant 0 : i32
    return %c0_i32, %c0_i32_0 : i32, i32
  }
  func.func @transform_2(%arg0: i32) -> (i32, i32) {
    %c0_i32 = arith.constant 0 : i32
    %c0_i32_0 = arith.constant 0 : i32
    %c0_i32_1 = arith.constant 0 : i32
    return %c0_i32, %c0_i32_0 : i32, i32
  }
  func.func @transform_3(%arg0: i32) -> (i32, i32) {
    %c0_i32 = arith.constant 0 : i32
    %c0_i32_0 = arith.constant 0 : i32
    %c0_i32_1 = arith.constant 0 : i32
    return %c0_i32, %c0_i32_0 : i32, i32
  }
  func.func @transform_4(%arg0: i32) -> (i32, i32) {
    %c0_i32 = arith.constant 0 : i32
    %c0_i32_0 = arith.constant 0 : i32
    %c0_i32_1 = arith.constant 0 : i32
    return %c0_i32, %c0_i32_0 : i32, i32
  }
  func.func @transform_5(%arg0: i32) -> (i32, i32) {
    %c0_i32 = arith.constant 0 : i32
    %c0_i32_0 = arith.constant 0 : i32
    %c0_i32_1 = arith.constant 0 : i32
    return %c0_i32, %c0_i32_0 : i32, i32
  }
  func.func @transform_6(%arg0: i32) -> (i32, i32) {
    %c0_i32 = arith.constant 0 : i32
    %c0_i32_0 = arith.constant 0 : i32
    %c0_i32_1 = arith.constant 0 : i32
    return %c0_i32, %c0_i32_0 : i32, i32
  }
  func.func @transform_7(%arg0: i32) -> (i32, i32) {
    %c0_i32 = arith.constant 0 : i32
    %c0_i32_0 = arith.constant 0 : i32
    %c0_i32_1 = arith.constant 0 : i32
    return %c0_i32, %c0_i32_0 : i32, i32
  }
  func.func @transform_8(%arg0: i32) -> (i32, i32) {
    %c0_i32 = arith.constant 0 : i32
    %c0_i32_0 = arith.constant 0 : i32
    %c0_i32_1 = arith.constant 0 : i32
    return %c0_i32, %c0_i32_0 : i32, i32
  }
  func.func @transform_9(%arg0: i32) -> (i32, i32) {
    %c0_i32 = arith.constant 0 : i32
    %c0_i32_0 = arith.constant 0 : i32
    return %arg0, %c0_i32 : i32, i32
  }
}

</mosaic_0001>

<bundles_post_ra>
// kernel: tpu_custom_call.1
= control target key start
LH: loop header
LB: loop body
LE: loop exit
PB: predicated region body
PF: predicated region fallthrough
CT: control target
= control target key end

     0   :  { %14 = vsyncpa [#allocation3], 0  ;;  %s1731_s0 = inlined_call_operand.hbm [shape: bf16[8,784], index: 0, kind: input, shape index: {}]   ;;  %s1732_s1 = inlined_call_operand.hbm [shape: bf16[784,128], index: 1, kind: input, shape index: {}]   ;;  %s1733_s2 = inlined_call_operand.vmem [shape: f32[1,128], index: 2, kind: input, shape index: {}]   ;;  %s1734_s3 = inlined_call_operand.hbm [shape: bf16[128,128], index: 3, kind: input, shape index: {}]   ;;  %s1735_s4 = inlined_call_operand.vmem [shape: f32[1,128], index: 4, kind: input, shape index: {}]   ;;  %s1736_s5 = inlined_call_operand.hbm [shape: bf16[128,128], index: 5, kind: input, shape index: {}]   ;;  %s1737_s6 = inlined_call_operand.vmem [shape: f32[1,128], index: 6, kind: input, shape index: {}]   ;;  %s1738_s7 = inlined_call_operand.hbm [shape: bf16[128,128], index: 7, kind: input, shape index: {}]   ;;  %s1739_s8 = inlined_call_operand.vmem [shape: f32[1,128], index: 8, kind: input, shape index: {}]   ;;  %s1740_s9 = inlined_call_operand.hbm [shape: f32[8,128], index: 9, kind: output, shape index: {}]  }
   0x1   :  { %15 = vsyncpa [#allocation6], 0 }
   0x2   :  { %16 = vsyncpa [#allocation9], 0 }
   0x3   :  { %17 = vsyncpa [#allocation4], 0  ;;  %s1542_s30 = smov [#allocation5]   ;;  %s1402_s13 = scalar_lea.hbm %s1732_s1, 6272 }
   0x4   :  { %s33_s10 = sshll.u32 %s1542_s30, 4  ;;  %p1403_p0 = scmp.ne.s32.totalorder %s1732_s1, %s1402_s13  ;;  %s34_s10 = int_to_ptr.vmem [resolvable:$true] %s33_s10 }
   0x5   :  { %p1406_p1 = scmp.lt.u32.totalorder %s1402_s13, %s1732_s1 }
   0x7   :  { %p1408_p2 = pnand %p1406_p1, %p1403_p0 }
   0x9   :  { %1411 = shalt.err (!%p1408_p2)
}
   0xa   :  { %s1412_s18 = scalar_lea.vmem %s34_s10, 6272  ;;  %p1417_p4 = scmp.lt.s32.totalorder %s34_s10, %s34_s10 }
   0xb   :  { %p1413_p3 = scmp.ne.s32.totalorder %s34_s10, %s1412_s18  ;;  %p1418_p5 = scmp.lt.s32.totalorder %s1412_s18, %s1412_s18 }
   0xd   :  { %p1419_p6 = por %p1418_p5, %p1417_p4 }
   0xf   :  { %p1420_p7 = pnand %p1419_p6, %p1413_p3 }
  0x11   :  { %1423 = shalt.err (!%p1420_p7)
}
  0x12   :  { %s1543_s19 = smov 64   ;;  %s1544_s20 = smov 4  }
  0x13   :  { %39 = dma.hbm_to_vmem [thread:$0]  %s1732_s1, 6272, %s34_s10, [#allocation6], %s1543_s19, %s1543_s19, %s1544_s20  }
  0x14   :  { %s1545_s23 = smov [#allocation8]   ;;  %s1546_s25 = smov [#allocation2]  }
  0x15   :  { %s61_s24 = sshll.u32 %s1545_s23, 4  ;;  %s24_s26 = sshll.u32 %s1546_s25, 4  ;;  %s62_s24 = int_to_ptr.vmem [resolvable:$true] %s61_s24  ;;  %s25_s26 = int_to_ptr.vmem [resolvable:$true] %s24_s26 }
  0x16   :  { %s1424_s29 = scalar_lea.hbm %s1736_s5, 1024 }
  0x17   :  { %p1425_p8 = scmp.ne.s32.totalorder %s1736_s5, %s1424_s29  ;;  %p1428_p9 = scmp.lt.u32.totalorder %s1424_s29, %s1736_s5 }
  0x19   :  { %p1430_p10 = pnand %p1428_p9, %p1425_p8 }
  0x1b   :  { %1433 = shalt.err (!%p1430_p10)
}
  0x1c   :  { %s1434_s1 = scalar_lea.vmem %s62_s24, 1024  ;;  %p1439_p12 = scmp.lt.s32.totalorder %s62_s24, %s62_s24 }
  0x1d   :  { %p1435_p11 = scmp.ne.s32.totalorder %s62_s24, %s1434_s1  ;;  %p1440_p13 = scmp.lt.s32.totalorder %s1434_s1, %s1434_s1 }
  0x1f   :  { %p1441_p0 = por %p1440_p13, %p1439_p12 }
  0x21   :  { %p1442_p1 = pnand %p1441_p0, %p1435_p11 }
  0x23   :  { %1445 = shalt.err (!%p1442_p1)
}
  0x24   :  { %67 = dma.hbm_to_vmem [thread:$0]  %s1736_s5, 1024, %s62_s24, [#allocation9], %s1543_s19, %s1543_s19, %s1544_s20  }
  0x25   :  { %s1446_s17 = scalar_lea.hbm %s1731_s0, 448 }
  0x26   :  { %p1447_p2 = scmp.ne.s32.totalorder %s1731_s0, %s1446_s17  ;;  %p1450_p3 = scmp.lt.u32.totalorder %s1446_s17, %s1731_s0 }
  0x28   :  { %p1452_p4 = pnand %p1450_p3, %p1447_p2 }
  0x2a   :  { %1455 = shalt.err (!%p1452_p4)
}
  0x2b   :  { %s1456_s25 = scalar_lea.vmem %s25_s26, 448  ;;  %p1461_p6 = scmp.lt.s32.totalorder %s25_s26, %s25_s26 }
  0x2c   :  { %p1457_p5 = scmp.ne.s32.totalorder %s25_s26, %s1456_s25  ;;  %p1462_p7 = scmp.lt.s32.totalorder %s1456_s25, %s1456_s25 }
  0x2e   :  { %p1463_p8 = por %p1462_p7, %p1461_p6 }
  0x30   :  { %p1464_p9 = pnand %p1463_p8, %p1457_p5 }
  0x32   :  { %1467 = shalt.err (!%p1464_p9)
}
  0x33   :  { %27 = dma.hbm_to_vmem [thread:$0]  %s1731_s0, 448, %s25_s26, [#allocation3]  }
  0x34   :  { %s1547_s27 = smov [#allocation7]   ;;  %s1548_s29 = smov [#allocation10]  }
  0x35   :  { %s47_s28 = sshll.u32 %s1547_s27, 4  ;;  %s75_s30 = sshll.u32 %s1548_s29, 4  ;;  %s48_s28 = int_to_ptr.vmem [resolvable:$true] %s47_s28  ;;  %s76_s30 = int_to_ptr.vmem [resolvable:$true] %s75_s30 }
  0x36   :  { %s1468_s13 = scalar_lea.hbm %s1734_s3, 1024 }
  0x37   :  { %p1469_p10 = scmp.ne.s32.totalorder %s1734_s3, %s1468_s13  ;;  %p1472_p11 = scmp.lt.u32.totalorder %s1468_s13, %s1734_s3 }
  0x39   :  { %p1474_p12 = pnand %p1472_p11, %p1469_p10 }
  0x3b   :  { %1477 = shalt.err (!%p1474_p12)
}
  0x3c   :  { %s1478_s0 = scalar_lea.vmem %s48_s28, 1024  ;;  %p1483_p0 = scmp.lt.s32.totalorder %s48_s28, %s48_s28 }
  0x3d   :  { %p1479_p13 = scmp.ne.s32.totalorder %s48_s28, %s1478_s0  ;;  %p1484_p1 = scmp.lt.s32.totalorder %s1478_s0, %s1478_s0 }
  0x3f   :  { %p1485_p2 = por %p1484_p1, %p1483_p0 }
  0x41   :  { %p1486_p3 = pnand %p1485_p2, %p1479_p13 }
  0x43   :  { %1489 = shalt.err (!%p1486_p3)
}
  0x44   :  { %53 = dma.hbm_to_vmem [thread:$0]  %s1734_s3, 1024, %s48_s28, [#allocation6], %s1543_s19, %s1543_s19, %s1544_s20  }
  0x45   :  { %s1490_s21 = scalar_lea.hbm %s1738_s7, 1024 }
  0x46   :  { %p1491_p4 = scmp.ne.s32.totalorder %s1738_s7, %s1490_s21  ;;  %p1494_p5 = scmp.lt.u32.totalorder %s1490_s21, %s1738_s7 }
  0x48   :  { %p1496_p6 = pnand %p1494_p5, %p1491_p4 }
  0x4a   :  { %1499 = shalt.err (!%p1496_p6)
}
  0x4b   :  { %s1500_s24 = scalar_lea.vmem %s76_s30, 1024  ;;  %p1505_p8 = scmp.lt.s32.totalorder %s76_s30, %s76_s30 }
  0x4c   :  { %p1501_p7 = scmp.ne.s32.totalorder %s76_s30, %s1500_s24  ;;  %p1506_p9 = scmp.lt.s32.totalorder %s1500_s24, %s1500_s24 }
  0x4e   :  { %p1507_p10 = por %p1506_p9, %p1505_p8 }
  0x50   :  { %p1508_p11 = pnand %p1507_p10, %p1501_p7 }
  0x52   :  { %1511 = shalt.err (!%p1508_p11)
}
  0x53   :  { %81 = dma.hbm_to_vmem [thread:$0]  %s1738_s7, 1024, %s76_s30, [#allocation9], %s1543_s19, %s1543_s19, %s1544_s20  }
  0x54   :  { %1534 = dma.done.wait [#allocation3], 448  }
  0x55   :  { %1535 = vsyncadd [#allocation3], 4294966848 }
  0x56   :  { %1536 = dma.done.wait [#allocation6], 7296  }
  0x57   :  { %1537 = vsyncadd [#allocation6], 4294960000 }
  0x58   :  { %1538 = dma.done.wait [#allocation9], 2048  }
  0x59   :  { %1539 = vsyncadd [#allocation9], 4294965248  ;;  %v1318_v0 = vld [vmem:[#allocation5 + $0x40] sm:$0xff]   ;;  %v1322_v4 = vld [vmem:[#allocation5 + $0x48] sm:$0xff]   ;;  %v1549_v43 = vmov 0.0   ;;  %vm1550_vm0 = vmmov 0  }
  0x5a   :  { %v1319_v1 = vld [vmem:[#allocation5] sm:$0xff]   ;;  %1147 = vmatprep.subr.bf16.mxu0 %v1318_v0  ;;  %v1323_v5 = vld [vmem:[#allocation5 + $0x8] sm:$0xff]   ;;  %v1326_v8 = vld [vmem:[#allocation5 + $0x50] sm:$0xff]   ;;  %vm527_vm1 = vcmask 130048  }
  0x5b   :  { %v1320_v2 = vld [vmem:[#allocation5 + $0xc0] sm:$0xff]   ;;  %1148 = vmatpush3.bf16.msra.mxu0 %v1319_v1  ;;  %v1324_v6 = vld [vmem:[#allocation5 + $0xc8] sm:$0xff]   ;;  %v1327_v9 = vld [vmem:[#allocation5 + $0x10] sm:$0xff]  }
  0x5c   :  { %v1321_v3 = vld [vmem:[#allocation5 + $0x80] sm:$0xff]   ;;  %1169 = vmatprep.subr.bf16.mxu1 %v1320_v2  ;;  %1149 = vmatprep.subr.bf16.mxu0 %v1322_v4  ;;  %v1325_v7 = vld [vmem:[#allocation5 + $0x88] sm:$0xff]   ;;  %v1328_v10 = vld [vmem:[#allocation5 + $0xd0] sm:$0xff]  }
  0x5d   :  { %1170 = vmatpush3.bf16.msra.mxu1 %v1321_v3  ;;  %v1329_v11 = vld [vmem:[#allocation5 + $0x90] sm:$0xff]   ;;  %v1330_v12 = vld [vmem:[#allocation5 + $0x58] sm:$0xff]   ;;  %v1334_v16 = vld [vmem:[#allocation5 + $0x60] sm:$0xff]  }
  0x5e   :  { %1171 = vmatprep.subr.bf16.mxu1 %v1324_v6  ;;  %v1331_v13 = vld [vmem:[#allocation5 + $0x18] sm:$0xff]   ;;  %v1335_v17 = vld [vmem:[#allocation5 + $0x20] sm:$0xff]   ;;  %v1338_v20 = vld [vmem:[#allocation5 + $0x68] sm:$0xff]  }
  0x5f   :  { %1150 = vmatpush3.bf16.msra.mxu0 %v1323_v5  ;;  %v1332_v14 = vld [vmem:[#allocation5 + $0xd8] sm:$0xff]   ;;  %v1336_v18 = vld [vmem:[#allocation5 + $0xe0] sm:$0xff]   ;;  %v1339_v21 = vld [vmem:[#allocation5 + $0x28] sm:$0xff]  }
  0x60   :  { %1151 = vmatprep.subr.bf16.mxu0 %v1326_v8  ;;  %v1333_v15 = vld [vmem:[#allocation5 + $0x98] sm:$0xff]   ;;  %v1337_v19 = vld [vmem:[#allocation5 + $0xa0] sm:$0xff]   ;;  %v1340_v22 = vld [vmem:[#allocation5 + $0xe8] sm:$0xff]  }
  0x61   :  { %1172 = vmatpush3.bf16.msra.mxu1 %v1325_v7  ;;  %v1341_v23 = vld [vmem:[#allocation5 + $0xa8] sm:$0xff]   ;;  %v1342_v24 = vld [vmem:[#allocation5 + $0x70] sm:$0xff]   ;;  %v1346_v28 = vld [vmem:[#allocation5 + $0x78] sm:$0xff]  }
  0x62   :  { %1173 = vmatprep.subr.bf16.mxu1 %v1328_v10  ;;  %v1343_v25 = vld [vmem:[#allocation5 + $0x30] sm:$0xff]   ;;  %v1347_v29 = vld [vmem:[#allocation5 + $0x38] sm:$0xff]   ;;  %v100_v31 = vld [vmem:[#allocation2] sm:$0xff] }
  0x63   :  { %1152 = vmatpush3.bf16.msra.mxu0 %v1327_v9  ;;  %v1344_v26 = vld [vmem:[#allocation5 + $0xf0] sm:$0xff]   ;;  %v1348_v30 = vld [vmem:[#allocation5 + $0xf8] sm:$0xff]   ;;  %v1063_v32 = vcombine.low %v100_v31, %v100_v31  ;;  %v1064_v33 = vcombine.high %v100_v31, %v100_v31  ;;  %v1352_v35 = vld [vmem:[#allocation5 + $0x140] sm:$0xff]  }
  0x64   :  { %1153 = vmatprep.subr.bf16.mxu0 %v1330_v12  ;;  %v1345_v27 = vld [vmem:[#allocation5 + $0xb0] sm:$0xff]   ;;  %v1351_v34 = vld [vmem:[#allocation5 + $0xb8] sm:$0xff]   ;;  %v1355_v39 = vld [vmem:[#allocation5 + $0x100] sm:$0xff]  }
  0x65   :  { %1174 = vmatpush3.bf16.msra.mxu1 %v1329_v11  ;;  %v101_v36 = vld [vmem:[#allocation2 + $0x8] sm:$0xff]  ;;  %563 = vmatprep.mubr.bf16.mxu0 %v1064_v33  ;;  %v1360_v45 = vld [vmem:[#allocation5 + $0x158] sm:$0xff]   ;;  %v1362_v47 = vld [vmem:[#allocation5 + $0x160] sm:$0xff]  }
  0x66   :  { %1175 = vmatprep.subr.bf16.mxu1 %v1332_v14  ;;  %v1065_v37 = vcombine.low %v101_v36, %v101_v36  ;;  %v1066_v38 = vcombine.high %v101_v36, %v101_v36  ;;  %v1356_v40 = vld [vmem:[#allocation5 + $0x148] sm:$0xff]   ;;  %v1358_v42 = vld [vmem:[#allocation5 + $0x150] sm:$0xff]   ;;  %v1361_v46 = vld [vmem:[#allocation5 + $0x118] sm:$0xff]  }
  0x67   :  { %1154 = vmatpush3.bf16.msra.mxu0 %v1331_v13  ;;  %v1357_v41 = vld [vmem:[#allocation5 + $0x108] sm:$0xff]   ;;  %v1359_v44 = vld [vmem:[#allocation5 + $0x110] sm:$0xff]   ;;  %v1363_v48 = vld [vmem:[#allocation5 + $0x120] sm:$0xff]  }
  0x68   :  { %1155 = vmatprep.subr.bf16.mxu0 %v1334_v16  ;;  %603 = vmatprep.mubr.bf16.mxu1 %v1066_v38  ;;  %v1364_v49 = vld [vmem:[#allocation5 + $0x168] sm:$0xff]   ;;  %v1370_v50 = vld [vmem:[#allocation5 + $0x180] sm:$0xff]   ;;  %v102_v51 = vld [vmem:[#allocation2 + $0x10] sm:$0xff] }
  0x69   :  { %1176 = vmatpush3.bf16.msra.mxu1 %v1333_v15  ;;  %v1365_v52 = vld [vmem:[#allocation5 + $0x128] sm:$0xff]   ;;  %v1068_v53 = vcombine.high %v102_v51, %v102_v51  ;;  %v1373_v54 = vld [vmem:[#allocation2 + $0x18] ss:$0 sps:$4 sm:$0xff]   ;;  %v1366_v55 = vld [vmem:[#allocation5 + $0x170] sm:$0xff]   ;;  %v1067_v59 = vcombine.low %v102_v51, %v102_v51 }
  0x6a   :  { %1177 = vmatprep.subr.bf16.mxu1 %v1336_v18  ;;  %v1367_v56 = vld [vmem:[#allocation5 + $0x130] sm:$0xff]   ;;  %v1368_v57 = vld [vmem:[#allocation5 + $0x178] sm:$0xff]   ;;  %v1374_v60 = vld [vmem:[#allocation7] sm:$0xff]  }
  0x6b   :  { %1156 = vmatpush3.bf16.msra.mxu0 %v1335_v17  ;;  %v1369_v58 = vld [vmem:[#allocation5 + $0x138] sm:$0xff]   ;;  %v1375_v61 = vld [vmem:[#allocation7 + $0x8] sm:$0xff]   ;;  %v1377_v63 = vld [vmem:[#allocation7 + $0x18] sm:$0xff]  }
  0x6c   :  { %1157 = vmatprep.subr.bf16.mxu0 %v1338_v20  ;;  %v1376_v62 = vld [vmem:[#allocation7 + $0x10] sm:$0xff]   ;;  %v1378_v0 = vld [vmem:[#allocation7 + $0x20] sm:$0xff]   ;;  %v1379_v1 = vld [vmem:[#allocation7 + $0x28] sm:$0xff]  }
  0x6d   :  { %1178 = vmatpush3.bf16.msra.mxu1 %v1337_v19  ;;  %v1380_v2 = vld [vmem:[#allocation7 + $0x30] sm:$0xff]   ;;  %v1381_v3 = vld [vmem:[#allocation7 + $0x38] sm:$0xff]   ;;  %v1382_v4 = vld [vmem:[#allocation8] sm:$0xff]  }
  0x6e   :  { %1179 = vmatprep.subr.bf16.mxu1 %v1340_v22  ;;  %v1383_v5 = vld [vmem:[#allocation8 + $0x8] sm:$0xff]   ;;  %v1384_v6 = vld [vmem:[#allocation8 + $0x10] sm:$0xff]   ;;  %v1385_v7 = vld [vmem:[#allocation8 + $0x18] sm:$0xff]  }
  0x6f   :  { %1158 = vmatpush3.bf16.msra.mxu0 %v1339_v21  ;;  %v1386_v8 = vld [vmem:[#allocation8 + $0x20] sm:$0xff]   ;;  %v1387_v9 = vld [vmem:[#allocation8 + $0x28] sm:$0xff]   ;;  %v1062_v11 = vld [vmem:[%s1733_s2] ss:$0 sm:$0xff] }
  0x70   :  { %1159 = vmatprep.subr.bf16.mxu0 %v1342_v24  ;;  %v1388_v36 = vld [vmem:[#allocation8 + $0x30] sm:$0xff]   ;;  %v1390_v38 = vld [vmem:[#allocation10] sm:$0xff]  }
  0x71   :  { %1180 = vmatpush3.bf16.msra.mxu1 %v1341_v23 }
  0x72   :  { %1181 = vmatprep.subr.bf16.mxu1 %v1344_v26 }
  0x73   :  { %1160 = vmatpush3.bf16.msra.mxu0 %v1343_v25 }
  0x74   :  { %1161 = vmatprep.subr.bf16.mxu0 %v1346_v28 }
  0x75   :  { %1182 = vmatpush3.bf16.msra.mxu1 %v1345_v27 }
  0x76   :  { %1183 = vmatprep.subr.bf16.mxu1 %v1348_v30 }
  0x77   :  { %1162 = vmatpush3.bf16.msra.mxu0 %v1347_v29 }
  0x78   :  { %1191 = vmatprep.subr.bf16.mxu0 %v1352_v35 }
  0x79   :  { %1184 = vmatpush3.bf16.msra.mxu1 %v1351_v34 }
  0x7a   :  { %564 = vmatmul.mubr.bf16.vlgmr.msra.gmra.mrb[0].mxu0 %v1063_v32  ;;  %1242 = vmatprep.subr.bf16.mxu1 %v1549_v43 }
  0x7b   :  { %1192 = vmatpush3.bf16.msra.mxu0 %v1355_v39  ;;  %643 = vmatprep.mubr.bf16.mxu0 %v1068_v53  ;;  %v1391_v39 = vld [vmem:[#allocation10 + $0x8] sm:$0xff]   ;;  %v1396_v53 = vld [vmem:[#allocation10 + $0x30] sm:$0xff]  }
  0x7c   :  { %604 = vmatmul.mubr.bf16.vlgmr.msra.gmra.mrb[0].mxu1 %v1065_v37  ;;  %1193 = vmatprep.subr.bf16.mxu0 %v1356_v40  ;;  %v1389_v37 = vld [vmem:[#allocation8 + $0x38] sm:$0xff]   ;;  %v1392_v40 = vld [vmem:[#allocation10 + $0x10] sm:$0xff]  }
  0x7d   :  { %1244 = vmatprep.mubr.msk.bf16.mxu1 %vm1550_vm0, %v1549_v43  ;;  %1243 = vmatpush3.bf16.msra.mxu1 %v1370_v50 }
  0x7e   :  { %1248 = vmatprep.subr.bf16.mxu1 %v1549_v43 }
  0x7f   :  { %1194 = vmatpush3.bf16.msra.mxu0 %v1357_v41  ;;  %v1393_v41 = vld [vmem:[#allocation10 + $0x18] sm:$0xff]  }
  0x80   :  { %1195 = vmatprep.subr.bf16.mxu0 %v1358_v42  ;;  %v1394_v42 = vld [vmem:[#allocation10 + $0x20] sm:$0xff]  }
  0x83   :  { %1196 = vmatpush3.bf16.msra.mxu0 %v1359_v44  ;;  %v1395_v44 = vld [vmem:[#allocation10 + $0x28] sm:$0xff]  }
  0x84   :  { %1197 = vmatprep.subr.bf16.mxu0 %v1360_v45  ;;  %1245 = vmatmul.mubr.msk.bf16.vlgmr.msra.gmra.mrb[4].mxu1 %vm527_vm1, %v1373_v54  ;;  %v1120_v45 = vld [vmem:[%s1735_s4] ss:$0 sm:$0xff] }
  0x85   :  { %1264 = vmatprep.mubr.msk.bf16.mxu1 %vm1550_vm0, %v1549_v43  ;;  %1249 = vmatpush3.bf16.msra.mxu1 %v1374_v60  ;;  %v1397_v54 = vld [vmem:[#allocation10 + $0x38] sm:$0xff]  }
  0x86   :  { %1250 = vmatprep.subr.bf16.mxu1 %v1549_v43 }
  0x87   :  { %1198 = vmatpush3.bf16.msra.mxu0 %v1361_v46 }
  0x88   :  { %1199 = vmatprep.subr.bf16.mxu0 %v1362_v47 }
  0x89   :  { %1251 = vmatpush3.bf16.msra.mxu1 %v1375_v61 }
  0x8a   :  { %1252 = vmatprep.subr.bf16.mxu1 %v1549_v43 }
  0x8b   :  { %1200 = vmatpush3.bf16.msra.mxu0 %v1363_v48 }
  0x8c   :  { %1201 = vmatprep.subr.bf16.mxu0 %v1364_v49 }
  0x8d   :  { %1253 = vmatpush3.bf16.msra.mxu1 %v1376_v62 }
  0x8e   :  { %1254 = vmatprep.subr.bf16.mxu1 %v1549_v43 }
  0x8f   :  { %1202 = vmatpush3.bf16.msra.mxu0 %v1365_v52 }
  0x90   :  { %1203 = vmatprep.subr.bf16.mxu0 %v1366_v55  ;;  %v1129_v55 = vld [vmem:[%s1737_s6] ss:$0 sm:$0xff]  ;;  %s1551_s6 = smov [#allocation11]  }
  0x91   :  { %1255 = vmatpush3.bf16.msra.mxu1 %v1377_v63  ;;  %v1030_v63 = vlaneseq  ;;  %s1051_s11 = sshll.u32 %s1551_s6, 4  ;;  %s1052_s11 = int_to_ptr.vmem [resolvable:$true] %s1051_s11 }
  0x92   :  { %1256 = vmatprep.subr.bf16.mxu1 %v1549_v43  ;;  %p1517_p13 = scmp.lt.s32.totalorder %s1052_s11, %s1052_s11 }
  0x93   :  { %1204 = vmatpush3.bf16.msra.mxu0 %v1367_v56 }
  0x94   :  { %1205 = vmatprep.subr.bf16.mxu0 %v1368_v57 }
  0x95   :  { %1257 = vmatpush3.bf16.msra.mxu1 %v1378_v0  ;;  %v1031_v0 = vand.u32 127, %v1030_v63 }
  0x96   :  { %1258 = vmatprep.subr.bf16.mxu1 %v1549_v43 }
  0x97   :  { %1206 = vmatpush3.bf16.msra.mxu0 %v1369_v58  ;;  %vm1032_vm2 = vcmp.lt.s32.totalorder %v1031_v0, 10 }
  0x98   :  { %1268 = vmatprep.subr.bf16.mxu0 %v1549_v43 }
  0x99   :  { %1259 = vmatpush3.bf16.msra.mxu1 %v1379_v1 }
  0x9a   :  { %644 = vmatmul.mubr.bf16.vlgmr.msra.gmra.mrb[4].mxu0 %v1067_v59  ;;  %1260 = vmatprep.subr.bf16.mxu1 %v1549_v43 }
  0x9b   :  { %1284 = vmatprep.mubr.msk.bf16.mxu0 %vm1550_vm0, %v1549_v43  ;;  %1269 = vmatpush3.bf16.msra.mxu0 %v1382_v4 }
  0x9c   :  { %1270 = vmatprep.subr.bf16.mxu0 %v1549_v43 }
  0x9d   :  { %1261 = vmatpush3.bf16.msra.mxu1 %v1380_v2 }
  0x9e   :  { %1262 = vmatprep.subr.bf16.mxu1 %v1549_v43 }
  0x9f   :  { %1271 = vmatpush3.bf16.msra.mxu0 %v1383_v5 }
  0xa0   :  { %1272 = vmatprep.subr.bf16.mxu0 %v1549_v43 }
  0xa1   :  { %1263 = vmatpush3.bf16.msra.mxu1 %v1381_v3 }
  0xa2   :  { %1288 = vmatprep.subr.bf16.mxu1 %v1549_v43 }
  0xa3   :  { %1273 = vmatpush3.bf16.msra.mxu0 %v1384_v6 }
  0xa4   :  { %1274 = vmatprep.subr.bf16.mxu0 %v1549_v43 }
  0xa7   :  { %1275 = vmatpush3.bf16.msra.mxu0 %v1385_v7 }
  0xa8   :  { %1276 = vmatprep.subr.bf16.mxu0 %v1549_v43 }
  0xab   :  { %1277 = vmatpush3.bf16.msra.mxu0 %v1386_v8 }
  0xac   :  { %1278 = vmatprep.subr.bf16.mxu0 %v1549_v43 }
  0xaf   :  { %1279 = vmatpush3.bf16.msra.mxu0 %v1387_v9 }
  0xb0   :  { %1280 = vmatprep.subr.bf16.mxu0 %v1549_v43 }
  0xb3   :  { %1281 = vmatpush3.bf16.msra.mxu0 %v1388_v36 }
  0xb4   :  { %1282 = vmatprep.subr.bf16.mxu0 %v1549_v43 }
  0xb7   :  { %1283 = vmatpush3.bf16.msra.mxu0 %v1389_v37 }
 0x14d   :  { %v1163_v10 = vpop.f32.mrb[0].mxu0 }
 0x14e   :  { %v1164_v12 = vpop.f32.mrb[1].mxu0 }
 0x14f   :  { %v1165_v13 = vadd.f32 %v1164_v12, %v1163_v10  ;;  %v1166_v14 = vpop.f32.mrb[2].mxu0  ;;  %v1185_v15 = vpop.f32.mrb[0].mxu1 }
 0x150   :  { %v1167_v16 = vpop.f32.mrb[3].mxu0  ;;  %v1186_v17 = vpop.f32.mrb[1].mxu1 }
 0x151   :  { %v566_v18 = vadd.f32 %v1165_v13, %v1062_v11  ;;  %v1187_v19 = vadd.f32 %v1186_v17, %v1185_v15  ;;  %v1188_v20 = vpop.f32.mrb[2].mxu1 }
 0x152   :  { %v1189_v21 = vpop.f32.mrb[3].mxu1 }
 0x153   :  { %v606_v22 = vadd.f32 %v1187_v19, %v566_v18 }
 0x157   :  { %v685_v23 = vpop.f32.mrb[4].mxu1 }
 0x158   :  { %v1246_v24 = vpop.f32.mrb[5].mxu1 }
 0x159   :  { %v688_v25 = vpop.f32.mrb[6].mxu1 }
 0x15a   :  { %v1247_v26 = vpop.f32.mrb[7].mxu1 }
 0x16d   :  { %v1207_v27 = vpop.f32.mrb[4].mxu0 }
 0x16e   :  { %v1208_v28 = vpop.f32.mrb[5].mxu0 }
 0x16f   :  { %v1209_v29 = vadd.f32 %v1208_v28, %v1207_v27  ;;  %v1210_v30 = vpop.f32.mrb[6].mxu0 }
 0x170   :  { %v1211_v31 = vpop.f32.mrb[7].mxu0 }
 0x171   :  { %v646_v32 = vadd.f32 %v1209_v29, %v606_v22 }
 0x173   :  { %v686_v33 = vadd.f32 %v685_v23, %v646_v32 }
 0x175   :  { %v691_v34 = vmax.f32 %v686_v33, 0.0 }
 0x177   :  { %v692_v35 = vpack.c.bf16 %v691_v34, %v691_v34 }
 0x179   :  { %1265 = vmatmul.mubr.bf16.vlgmr.msra.gmra.mrb[8].mxu1 %v692_v35 }
 0x17a   :  { %1304 = vmatprep.mubr.msk.bf16.mxu1 %vm1550_vm0, %v1549_v43  ;;  %1289 = vmatpush3.bf16.msra.mxu1 %v1390_v38 }
 0x17b   :  { %1290 = vmatprep.subr.bf16.mxu1 %v1549_v43 }
 0x17e   :  { %1291 = vmatpush3.bf16.msra.mxu1 %v1391_v39 }
 0x17f   :  { %1292 = vmatprep.subr.bf16.mxu1 %v1549_v43 }
 0x182   :  { %1293 = vmatpush3.bf16.msra.mxu1 %v1392_v40 }
 0x183   :  { %1294 = vmatprep.subr.bf16.mxu1 %v1549_v43 }
 0x186   :  { %1295 = vmatpush3.bf16.msra.mxu1 %v1393_v41 }
 0x187   :  { %1296 = vmatprep.subr.bf16.mxu1 %v1549_v43 }
 0x18a   :  { %1297 = vmatpush3.bf16.msra.mxu1 %v1394_v42 }
 0x18b   :  { %1298 = vmatprep.subr.bf16.mxu1 %v1549_v43 }
 0x18e   :  { %1299 = vmatpush3.bf16.msra.mxu1 %v1395_v44 }
 0x18f   :  { %1300 = vmatprep.subr.bf16.mxu1 %v1549_v43 }
 0x192   :  { %1301 = vmatpush3.bf16.msra.mxu1 %v1396_v53 }
 0x193   :  { %1302 = vmatprep.subr.bf16.mxu1 %v1549_v43  ;;  %v1138_v43 = vld [vmem:[%s1739_s8] ss:$0 sm:$0xff]  ;;  %s1512_s8 = scalar_lea.vmem %s1052_s11, 128 }
 0x194   :  { %p1513_p12 = scmp.ne.s32.totalorder %s1052_s11, %s1512_s8  ;;  %p1518_p0 = scmp.lt.s32.totalorder %s1512_s8, %s1512_s8 }
 0x196   :  { %1303 = vmatpush3.bf16.msra.mxu1 %v1397_v54  ;;  %p1519_p1 = por %p1518_p0, %p1517_p13 }
 0x198   :  { %p1520_p2 = pnand %p1519_p1, %p1513_p12 }
 0x24c   :  { %v798_v46 = vpop.f32.mrb[8].mxu1 }
 0x24d   :  { %v799_v47 = vadd.f32 %v1120_v45, %v798_v46  ;;  %v1266_v48 = vpop.f32.mrb[9].mxu1 }
 0x24e   :  { %v801_v49 = vpop.f32.mrb[10].mxu1 }
 0x24f   :  { %v804_v50 = vmax.f32 %v799_v47, 0.0  ;;  %v1267_v51 = vpop.f32.mrb[11].mxu1 }
 0x251   :  { %v805_v52 = vpack.c.bf16 %v804_v50, %v804_v50 }
 0x253   :  { %1285 = vmatmul.mubr.bf16.vlgmr.msra.gmra.mrb[8].mxu0 %v805_v52 }
 0x326   :  { %v911_v56 = vpop.f32.mrb[8].mxu0 }
 0x327   :  { %v912_v57 = vadd.f32 %v1129_v55, %v911_v56  ;;  %v1286_v58 = vpop.f32.mrb[9].mxu0 }
 0x328   :  { %v914_v59 = vpop.f32.mrb[10].mxu0 }
 0x329   :  { %v917_v60 = vmax.f32 %v912_v57, 0.0  ;;  %v1287_v61 = vpop.f32.mrb[11].mxu0 }
 0x32b   :  { %v918_v62 = vpack.c.bf16 %v917_v60, %v917_v60 }
 0x32d   :  { %1305 = vmatmul.mubr.bf16.vlgmr.msra.gmra.mrb[12].mxu1 %v918_v62 }
 0x400   :  { %v1024_v1 = vpop.f32.mrb[12].mxu1 }
 0x401   :  { %v1025_v2 = vadd.f32 %v1138_v43, %v1024_v1  ;;  %v1306_v3 = vpop.f32.mrb[13].mxu1 }
 0x402   :  { %v1027_v4 = vpop.f32.mrb[14].mxu1 }
 0x403   :  { %v1307_v5 = vpop.f32.mrb[15].mxu1  ;;  %v1033_v6 = vsel %vm1032_vm2, %v1025_v2, -inf }
 0x404   :  { %1034 = vmax.xlane.f32.xlu0 %v1033_v6 }
 0x491   :  { %v1035_v7 = vpop.xlane.xlu0 %1034 }
 0x492   :  { %v1036_v8 = vsub.f32 %v1033_v6, %v1035_v7 }
 0x494   :  { %v1037_v9 = vmul.f32 1.442695, %v1036_v8 }
 0x496   :  { %1398 = vpow2.f32 %v1037_v9 }
 0x4a0   :  { %v1399_v10 = vpop.eup %1398 }
 0x4a1   :  { %1039 = vadd.xlane.f32.xlu0 %v1399_v10 }
 0x52e   :  { %v1040_v11 = vpop.xlane.xlu0 %1039 }
 0x52f   :  { %1400 = vlog2.f32 %v1040_v11 }
 0x539   :  { %v1401_v12 = vpop.eup %1400 }
 0x53a   :  { %v1042_v13 = vmul.f32 0.6931472, %v1401_v12 }
 0x53c   :  { %v1043_v14 = vsub.f32 %v1036_v8, %v1042_v13 }
 0x53e   :  { %1044 = vst [vmem:[#allocation11] sm:$0xff] %v1043_v14 }
 0x53f   :  { %1523 = shalt.err (!%p1520_p2)
}
 0x540   :  { %s1524_s1 = scalar_lea.hbm %s1740_s9, 128 }
 0x541   :  { %p1525_p3 = scmp.ne.s32.totalorder %s1740_s9, %s1524_s1  ;;  %p1528_p4 = scmp.lt.u32.totalorder %s1524_s1, %s1740_s9 }
 0x543   :  { %p1530_p5 = pnand %p1528_p4, %p1525_p3 }
 0x545   :  { %1533 = shalt.err (!%p1530_p5)
}
 0x546   :  { %1054 = dma.vmem_to_hbm [thread:$0]  %s1052_s11, 128, %s1740_s9, [#allocation4]  }
 0x547   :  { %1540 = dma.done.wait [#allocation4], 128  }
 0x548   :  { %1541 = vsyncadd [#allocation4], 4294967168 }
 0x549   :  { %1058 = vsyncpa [#allocation3], 1 }
 0x54a   :  { %1059 = vsyncpa [#allocation6], 1 }
 0x54b   :  { %1060 = vsyncpa [#allocation9], 1 }
 0x54c   :  { %1061 = vsyncpa [#allocation4], 1 }

</bundles_post_ra>
